<compile_context>
chip_gen: v5e
topology: v5e:2x2
jax: 0.10.0
libtpu: 0.0.40
codegen_flags: <defaults>
</compile_context>

<pallas_src>
import functools

import jax
import jax.numpy as jnp
from jax.experimental import pallas as pl
from jax.experimental.pallas import tpu as pltpu

EPS = 1e-5            # PyTorch BatchNorm1d default eps
MAX_BLOCK_N = 8192    # batch columns per grid step (lane axis)


def mlp_kernel(x_ref,
               w1_ref, b1_ref,
               w2_ref, b2_ref,
               w3_ref, b3_ref,
               w4_ref, b4_ref,
               o_ref):
    """Fused forward on one batch block, transposed layout (features x batch).

    x_ref: (5, BN) f32      w_k: (out_k, in_k) bf16     b_k: (out_k, 1) f32
    w4_ref: (25, 1) f32     b4_ref: (1, 1) f32          o_ref: (1, BN) f32
    BatchNorm is pre-folded into w/b; Dropout(p=0.5) is identity in eval mode.
    """
    # fc1 + bn1 + relu  (bf16 operands, f32 accumulate)
    h = x_ref[...].astype(jnp.bfloat16)                              # (5,  BN)
    h = jnp.maximum(
        jnp.dot(w1_ref[...], h, preferred_element_type=jnp.float32)
        + b1_ref[...], 0.0).astype(jnp.bfloat16)                     # (25, BN)
    # fc2 + bn2 + relu
    h = jnp.maximum(
        jnp.dot(w2_ref[...], h, preferred_element_type=jnp.float32)
        + b2_ref[...], 0.0).astype(jnp.bfloat16)                     # (125,BN)
    # fc3 + bn3 + relu
    h = jnp.maximum(
        jnp.dot(w3_ref[...], h, preferred_element_type=jnp.float32)
        + b3_ref[...], 0.0).astype(jnp.bfloat16)                     # (25, BN)
    # fc4 (25 -> 1): off the MXU — per-lane multiply + cross-sublane reduce.
    o_ref[...] = (jnp.sum(h.astype(jnp.float32) * w4_ref[...],
                          axis=0, keepdims=True)
                  + b4_ref[...])                                     # (1,  BN)
    # TODO(synk): training-mode dropout / batch-stat BatchNorm not implemented;
    # eval-mode semantics only.


def init_params(key):
    """Deterministic params matching the torch module's shapes.

    Linear weights are (in, out).  BatchNorm params gamma/beta/mean/var are
    (1, C).  Returned in layer order (22 arrays).
    """
    dims = [(5, 25), (25, 125), (125, 25), (25, 1)]
    keys = jax.random.split(key, 16)
    params = []
    ki = 0
    for li, (din, dout) in enumerate(dims):
        w = (jax.random.normal(keys[ki], (din, dout), jnp.float32)
             * (1.0 / jnp.sqrt(din)))
        ki += 1
        b = jax.random.normal(keys[ki], (1, dout), jnp.float32) * 0.1
        ki += 1
        params.append(w)
        params.append(b)
        if li < 3:  # BN only after fc1/fc2/fc3
            gamma = 1.0 + 0.05 * jax.random.normal(keys[ki], (1, dout), jnp.float32)
            ki += 1
            beta = 0.05 * jax.random.normal(keys[ki], (1, dout), jnp.float32)
            ki += 1
            rmean = 0.1 * jnp.arange(dout, dtype=jnp.float32).reshape(1, dout) / dout
            rvar = 1.0 + 0.01 * jnp.arange(dout, dtype=jnp.float32).reshape(1, dout)
            params.append(gamma)
            params.append(beta)
            params.append(rmean)
            params.append(rvar)
    return params


def fold_bn_into_linear(params):
    """Fold eval-mode BatchNorm into the preceding Linear (done once, in JAX).

    Returns kernel-ready arrays (transposed layout):
      w1..w3: (out, in) bf16, b1..b3: (out, 1) f32,
      w4: (25, 1) f32 column (for the VPU/XLU fc4 path), b4: (1, 1) f32.
    """
    (w1, b1, g1, be1, m1, v1,
     w2, b2, g2, be2, m2, v2,
     w3, b3, g3, be3, m3, v3,
     w4, b4) = params

    def fold(w, b, g, be, m, v):
        scale = g * jax.lax.rsqrt(v + EPS)                  # (1, C)
        w_f = (w * scale).T.astype(jnp.bfloat16)            # (C, in) bf16
        b_f = ((b - m) * scale + be).T                      # (C, 1)  f32
        return w_f, b_f

    w1t, b1c = fold(w1, b1, g1, be1, m1, v1)
    w2t, b2c = fold(w2, b2, g2, be2, m2, v2)
    w3t, b3c = fold(w3, b3, g3, be3, m3, v3)
    # fc4 stays f32: it is computed on the VPU/XLU, not the MXU.
    return [w1t, b1c, w2t, b2c, w3t, b3c,
            w4.astype(jnp.float32),            # (25, 1)
            b4.T.astype(jnp.float32)]          # (1, 1)


def _choose_block_n(n):
    """Balanced, lane-aligned batch blocks.

    Minimizes tail padding (<128 wasted cols per block) and keeps >=2 (even)
    grid steps when cheap so v7x's two TensorCores both get work.
    """
    num_blocks = pl.cdiv(n, MAX_BLOCK_N)
    if n > 128:
        if num_blocks < 2:
            num_blocks = 2
        elif num_blocks % 2:
            num_blocks += 1
    return max(128, pl.cdiv(pl.cdiv(n, num_blocks), 128) * 128)


def mlp_forward(x, folded, *, block_n=None):
    """x: any shape with size % 5 == 0 (torch x.view(-1, 5) semantics)."""
    assert x.size % 5 == 0, "input size must be a multiple of 5 (view(-1, 5))"
    x2d = x.reshape(-1, 5).astype(jnp.float32)
    n = x2d.shape[0]
    if block_n is None:
        block_n = _choose_block_n(n)

    # Batch rides the lane axis (lane-dense loads/stores); no host-side pad —
    # Pallas masks the ragged last block and tail columns are independent.
    xT = x2d.T                                              # (5, n)

    const = lambda i: (0, 0)   # weights/biases: constant block -> stay resident
    grid_spec = pltpu.PrefetchScalarGridSpec(
        num_scalar_prefetch=0,
        grid=(pl.cdiv(n, block_n),),
        in_specs=[pl.BlockSpec((5, block_n), lambda i: (0, i))]
                 + [pl.BlockSpec(a.shape, const) for a in folded],
        out_specs=pl.BlockSpec((1, block_n), lambda i: (0, i)),
    )

    outT = pl.pallas_call(
        mlp_kernel,
        out_shape=jax.ShapeDtypeStruct((1, n), jnp.float32),
        grid_spec=grid_spec,
        compiler_params=pltpu.CompilerParams(
            dimension_semantics=("parallel",),     # shard grid across v7x's 2 TCs
            vmem_limit_bytes=48 * 1024 * 1024),    # > v5e's 16 MiB scoped default
    )(xT, *folded)

    return outT[0].reshape(n, 1)


def mlp_reference(x, params):
    """Pure-JAX f32 reference (unfolded BN) for correctness check."""
    x = x.reshape(-1, 5).astype(jnp.float32)
    (w1, b1, g1, be1, m1, v1,
     w2, b2, g2, be2, m2, v2,
     w3, b3, g3, be3, m3, v3,
     w4, b4) = params

    def block(h, w, b, g, be, m, v):
        h = h @ w + b
        h = (h - m) / jnp.sqrt(v + EPS) * g + be
        return jnp.maximum(h, 0.0)

    h = block(x, w1, b1, g1, be1, m1, v1)
    h = block(h, w2, b2, g2, be2, m2, v2)
    h = block(h, w3, b3, g3, be3, m3, v3)
    return h @ w4 + b4


if __name__ == "__main__":
    key = jax.random.PRNGKey(0)
    pkey, xkey1, xkey2 = jax.random.split(key, 3)
    params = init_params(pkey)

    # BN fold / transposes hoisted out of the per-call path (done once).
    folded = fold_bn_into_linear(params)
    fwd = jax.jit(functools.partial(mlp_forward, folded=folded))

    def rel_err(out, ref):
        return float(jnp.max(jnp.abs(out - ref)) / (jnp.max(jnp.abs(ref)) + 1e-6))

    # Small deterministic input; view(-1, 5) -> (8, 5). Exercises the ragged
    # (block > n) single-step path.
    x_small = jax.random.normal(xkey1, (8, 5), jnp.float32)
    out_small = jax.block_until_ready(fwd(x_small))
    ref_small = mlp_reference(x_small, params)
    assert out_small.shape == (8, 1), out_small.shape
    e = rel_err(out_small, ref_small)
    assert e < 0.05, f"small-batch mismatch: rel err {e}"

    # Larger batch: exercises the multi-step pipelined grid + ragged last block
    # (block_n auto-chosen -> 2 steps of 512 for n=1000).
    x_big = jax.random.normal(xkey2, (1000, 5), jnp.float32)
    out_big = jax.block_until_ready(fwd(x_big))
    ref_big = mlp_reference(x_big, params)
    assert out_big.shape == (1000, 1), out_big.shape
    e = rel_err(out_big, ref_big)
    assert e < 0.05, f"tiled-batch mismatch: rel err {e}"

    print("KERNEL_OK")
</pallas_src>

<mosaic_0001>
module attributes {stable_mosaic.version = 11 : i64} {
  func.func @mlp_kernel(%arg0: i32, %arg1: memref<5x128xf32, #tpu.memory_space<vmem>>, %arg2: memref<25x5xbf16, #tpu.memory_space<vmem>>, %arg3: memref<25x1xf32, #tpu.memory_space<vmem>>, %arg4: memref<125x25xbf16, #tpu.memory_space<vmem>>, %arg5: memref<125x1xf32, #tpu.memory_space<vmem>>, %arg6: memref<25x125xbf16, #tpu.memory_space<vmem>>, %arg7: memref<25x1xf32, #tpu.memory_space<vmem>>, %arg8: memref<25x1xf32, #tpu.memory_space<vmem>>, %arg9: memref<1x1xf32, #tpu.memory_space<vmem>>, %arg10: memref<1x128xf32, #tpu.memory_space<vmem>>) attributes {dimension_semantics = [#tpu.dimension_semantics<parallel>], iteration_bounds = array<i64: 1>, scalar_prefetch = 0 : i64, scratch_operands = 0 : i64, tpu.core_type = #tpu.core_type<tc>, window_params = [{transform_indices = @transform_0, window_bounds = array<i64: 5, 128>}, {pipeline_mode = #tpu.pipeline_mode<synchronous>, transform_indices = @transform_1, window_bounds = array<i64: 25, 5>}, {pipeline_mode = #tpu.pipeline_mode<synchronous>, transform_indices = @transform_2, window_bounds = array<i64: 25, 1>}, {pipeline_mode = #tpu.pipeline_mode<synchronous>, transform_indices = @transform_3, window_bounds = array<i64: 125, 25>}, {pipeline_mode = #tpu.pipeline_mode<synchronous>, transform_indices = @transform_4, window_bounds = array<i64: 125, 1>}, {pipeline_mode = #tpu.pipeline_mode<synchronous>, transform_indices = @transform_5, window_bounds = array<i64: 25, 125>}, {pipeline_mode = #tpu.pipeline_mode<synchronous>, transform_indices = @transform_6, window_bounds = array<i64: 25, 1>}, {pipeline_mode = #tpu.pipeline_mode<synchronous>, transform_indices = @transform_7, window_bounds = array<i64: 25, 1>}, {pipeline_mode = #tpu.pipeline_mode<synchronous>, transform_indices = @transform_8, window_bounds = array<i64: 1, 1>}, {transform_indices = @transform_9, window_bounds = array<i64: 1, 128>}]} {
    %c0 = arith.constant 0 : index
    %c0_0 = arith.constant 0 : index
    %0 = vector.load %arg1[%c0, %c0_0] : memref<5x128xf32, #tpu.memory_space<vmem>>, vector<5x128xf32>
    %1 = arith.truncf %0 : vector<5x128xf32> to vector<5x128xbf16>
    %c0_1 = arith.constant 0 : index
    %c0_2 = arith.constant 0 : index
    %2 = vector.load %arg2[%c0_1, %c0_2] : memref<25x5xbf16, #tpu.memory_space<vmem>>, vector<25x5xbf16>
    %cst = arith.constant dense<0.000000e+00> : vector<25x128xf32>
    %3 = tpu.matmul %2, %1, %cst {dimension_numbers = #tpu.dot_dimension_numbers<[1], [0], [0], [1], [0, 0, 1, 1], [], []>} : vector<25x5xbf16>, vector<5x128xbf16>, vector<25x128xf32> -> vector<25x128xf32>
    %c0_3 = arith.constant 0 : index
    %c0_4 = arith.constant 0 : index
    %4 = vector.load %arg3[%c0_3, %c0_4] : memref<25x1xf32, #tpu.memory_space<vmem>>, vector<25x1xf32>
    %5 = vector.broadcast %4 : vector<25x1xf32> to vector<25x128xf32>
    %6 = arith.addf %3, %5 : vector<25x128xf32>
    %cst_5 = arith.constant 0.000000e+00 : f32
    %7 = vector.broadcast %cst_5 : f32 to vector<25x128xf32>
    %8 = arith.maximumf %6, %7 : vector<25x128xf32>
    %9 = arith.truncf %8 : vector<25x128xf32> to vector<25x128xbf16>
    %c0_6 = arith.constant 0 : index
    %c0_7 = arith.constant 0 : index
    %10 = vector.load %arg4[%c0_6, %c0_7] : memref<125x25xbf16, #tpu.memory_space<vmem>>, vector<125x25xbf16>
    %cst_8 = arith.constant dense<0.000000e+00> : vector<125x128xf32>
    %11 = tpu.matmul %10, %9, %cst_8 {dimension_numbers = #tpu.dot_dimension_numbers<[1], [0], [0], [1], [0, 0, 1, 1], [], []>} : vector<125x25xbf16>, vector<25x128xbf16>, vector<125x128xf32> -> vector<125x128xf32>
    %c0_9 = arith.constant 0 : index
    %c0_10 = arith.constant 0 : index
    %12 = vector.load %arg5[%c0_9, %c0_10] : memref<125x1xf32, #tpu.memory_space<vmem>>, vector<125x1xf32>
    %13 = vector.broadcast %12 : vector<125x1xf32> to vector<125x128xf32>
    %14 = arith.addf %11, %13 : vector<125x128xf32>
    %cst_11 = arith.constant 0.000000e+00 : f32
    %15 = vector.broadcast %cst_11 : f32 to vector<125x128xf32>
    %16 = arith.maximumf %14, %15 : vector<125x128xf32>
    %17 = arith.truncf %16 : vector<125x128xf32> to vector<125x128xbf16>
    %c0_12 = arith.constant 0 : index
    %c0_13 = arith.constant 0 : index
    %18 = vector.load %arg6[%c0_12, %c0_13] : memref<25x125xbf16, #tpu.memory_space<vmem>>, vector<25x125xbf16>
    %cst_14 = arith.constant dense<0.000000e+00> : vector<25x128xf32>
    %19 = tpu.matmul %18, %17, %cst_14 {dimension_numbers = #tpu.dot_dimension_numbers<[1], [0], [0], [1], [0, 0, 1, 1], [], []>} : vector<25x125xbf16>, vector<125x128xbf16>, vector<25x128xf32> -> vector<25x128xf32>
    %c0_15 = arith.constant 0 : index
    %c0_16 = arith.constant 0 : index
    %20 = vector.load %arg7[%c0_15, %c0_16] : memref<25x1xf32, #tpu.memory_space<vmem>>, vector<25x1xf32>
    %21 = vector.broadcast %20 : vector<25x1xf32> to vector<25x128xf32>
    %22 = arith.addf %19, %21 : vector<25x128xf32>
    %cst_17 = arith.constant 0.000000e+00 : f32
    %23 = vector.broadcast %cst_17 : f32 to vector<25x128xf32>
    %24 = arith.maximumf %22, %23 : vector<25x128xf32>
    %25 = arith.truncf %24 : vector<25x128xf32> to vector<25x128xbf16>
    %26 = arith.extf %25 : vector<25x128xbf16> to vector<25x128xf32>
    %c0_18 = arith.constant 0 : index
    %c0_19 = arith.constant 0 : index
    %27 = vector.load %arg8[%c0_18, %c0_19] : memref<25x1xf32, #tpu.memory_space<vmem>>, vector<25x1xf32>
    %28 = vector.broadcast %27 : vector<25x1xf32> to vector<25x128xf32>
    %29 = arith.mulf %26, %28 : vector<25x128xf32>
    %cst_20 = arith.constant dense<0.000000e+00> : vector<128xf32>
    %30 = vector.multi_reduction <add>, %29, %cst_20 [0] : vector<25x128xf32> to vector<128xf32>
    %31 = vector.shape_cast %30 : vector<128xf32> to vector<1x128xf32>
    %c0_21 = arith.constant 0 : index
    %c0_22 = arith.constant 0 : index
    %32 = vector.load %arg9[%c0_21, %c0_22] : memref<1x1xf32, #tpu.memory_space<vmem>>, vector<1x1xf32>
    %33 = vector.broadcast %32 : vector<1x1xf32> to vector<1x128xf32>
    %34 = arith.addf %31, %33 : vector<1x128xf32>
    %c0_23 = arith.constant 0 : index
    %c0_24 = arith.constant 0 : index
    %35 = vector.load %arg10[%c0_23, %c0_24] : memref<1x128xf32, #tpu.memory_space<vmem>>, vector<1x128xf32>
    tpu.vector_store %arg10[%c0_23, %c0_24], %34 {strides = array<i32>} : memref<1x128xf32, #tpu.memory_space<vmem>>, vector<1x128xf32>,
    return
  }
  func.func @transform_0(%arg0: i32) -> (i32, i32) {
    %c0_i32 = arith.constant 0 : i32
    %c0_i32_0 = arith.constant 0 : i32
    return %c0_i32, %arg0 : i32, i32
  }
  func.func @transform_1(%arg0: i32) -> (i32, i32) {
    %c0_i32 = arith.constant 0 : i32
    %c0_i32_0 = arith.constant 0 : i32
    %c0_i32_1 = arith.constant 0 : i32
    return %c0_i32, %c0_i32_0 : i32, i32
  }
  func.func @transform_2(%arg0: i32) -> (i32, i32) {
    %c0_i32 = arith.constant 0 : i32
    %c0_i32_0 = arith.constant 0 : i32
    %c0_i32_1 = arith.constant 0 : i32
    return %c0_i32, %c0_i32_0 : i32, i32
  }
  func.func @transform_3(%arg0: i32) -> (i32, i32) {
    %c0_i32 = arith.constant 0 : i32
    %c0_i32_0 = arith.constant 0 : i32
    %c0_i32_1 = arith.constant 0 : i32
    return %c0_i32, %c0_i32_0 : i32, i32
  }
  func.func @transform_4(%arg0: i32) -> (i32, i32) {
    %c0_i32 = arith.constant 0 : i32
    %c0_i32_0 = arith.constant 0 : i32
    %c0_i32_1 = arith.constant 0 : i32
    return %c0_i32, %c0_i32_0 : i32, i32
  }
  func.func @transform_5(%arg0: i32) -> (i32, i32) {
    %c0_i32 = arith.constant 0 : i32
    %c0_i32_0 = arith.constant 0 : i32
    %c0_i32_1 = arith.constant 0 : i32
    return %c0_i32, %c0_i32_0 : i32, i32
  }
  func.func @transform_6(%arg0: i32) -> (i32, i32) {
    %c0_i32 = arith.constant 0 : i32
    %c0_i32_0 = arith.constant 0 : i32
    %c0_i32_1 = arith.constant 0 : i32
    return %c0_i32, %c0_i32_0 : i32, i32
  }
  func.func @transform_7(%arg0: i32) -> (i32, i32) {
    %c0_i32 = arith.constant 0 : i32
    %c0_i32_0 = arith.constant 0 : i32
    %c0_i32_1 = arith.constant 0 : i32
    return %c0_i32, %c0_i32_0 : i32, i32
  }
  func.func @transform_8(%arg0: i32) -> (i32, i32) {
    %c0_i32 = arith.constant 0 : i32
    %c0_i32_0 = arith.constant 0 : i32
    %c0_i32_1 = arith.constant 0 : i32
    return %c0_i32, %c0_i32_0 : i32, i32
  }
  func.func @transform_9(%arg0: i32) -> (i32, i32) {
    %c0_i32 = arith.constant 0 : i32
    %c0_i32_0 = arith.constant 0 : i32
    return %c0_i32, %arg0 : i32, i32
  }
}

</mosaic_0001>

<bundles_post_ra>
// kernel: mlp_forward.1
= control target key start
LH: loop header
LB: loop body
LE: loop exit
PB: predicated region body
PF: predicated region fallthrough
CT: control target
= control target key end

     0   :  { %s1016_s0 = inlined_call_operand.vmem [shape: f32[5,8], index: 0, kind: input, shape index: {}]   ;;  %s1017_s1 = inlined_call_operand.hbm [shape: bf16[25,5], index: 1, kind: input, shape index: {}]   ;;  %s1018_s2 = inlined_call_operand.hbm [shape: f32[25,1], index: 2, kind: input, shape index: {}]   ;;  %s1019_s3 = inlined_call_operand.hbm [shape: bf16[125,25], index: 3, kind: input, shape index: {}]   ;;  %s1020_s4 = inlined_call_operand.hbm [shape: f32[125,1], index: 4, kind: input, shape index: {}]   ;;  %s1021_s5 = inlined_call_operand.vmem [shape: bf16[25,125], index: 5, kind: input, shape index: {}]   ;;  %s1022_s6 = inlined_call_operand.hbm [shape: f32[25,1], index: 6, kind: input, shape index: {}]   ;;  %s1023_s7 = inlined_call_operand.hbm [shape: f32[25,1], index: 7, kind: input, shape index: {}]   ;;  %s1024_s8 = inlined_call_operand.<no memory space> [shape: f32[1,1], index: 8, kind: input, shape index: {}]   ;;  %s1025_s9 = inlined_call_operand.hbm [shape: f32[1,8], index: 9, kind: output, shape index: {}]  }
   0x1   :  { %v14_v0 = vstv %s1024_s8 }
   0x2   :  { %15 = vst [vmem:[#allocation2] sm:$0x1] %v14_v0 }
   0x3   :  { %16 = vsyncpa [#allocation4], 0 }
   0x4   :  { %17 = vsyncpa [#allocation7], 0 }
   0x5   :  { %18 = vsyncpa [#allocation10], 0 }
   0x6   :  { %19 = vsyncpa [#allocation13], 0  ;;  %s40_s13 = sshll.u32 %s1018_s2, 4  ;;  %s41_s13 = int_to_ptr.hbm [resolvable:$true] %s40_s13 }
   0x7   :  { %20 = vsyncpa [#allocation5], 0  ;;  %s885_s14 = smov [#allocation6]   ;;  %s66_s18 = sshll.u32 %s1020_s4, 4  ;;  %s67_s18 = int_to_ptr.hbm [resolvable:$true] %s66_s18 }
   0x8   :  { %s42_s15 = sshll.u32 %s885_s14, 4  ;;  %s886_s19 = smov 128   ;;  %s43_s15 = int_to_ptr.vmem [resolvable:$true] %s42_s15 }
   0x9   :  { %s887_s8 = smov 8   ;;  %s888_s20 = smov [#allocation9]  }
   0xa   :  { %48 = dma.hbm_to_vmem [thread:$0]  %s41_s13, 512, %s43_s15, [#allocation7], %s886_s19, %s886_s19, %s887_s8  }
   0xb   :  { %s68_s21 = sshll.u32 %s888_s20, 4  ;;  %s27_s23 = sshll.u32 %s1017_s1, 4  ;;  %s69_s21 = int_to_ptr.vmem [resolvable:$true] %s68_s21  ;;  %s28_s23 = int_to_ptr.hbm [resolvable:$true] %s27_s23 }
   0xc   :  { %74 = dma.hbm_to_vmem [thread:$0]  %s67_s18, 2048, %s69_s21, [#allocation10], %s886_s19, %s886_s19, %s887_s8  }
   0xd   :  { %s889_s4 = smov [#allocation3]   ;;  %s53_s27 = sshll.u32 %s1019_s3, 4  ;;  %s54_s27 = int_to_ptr.hbm [resolvable:$true] %s53_s27 }
   0xe   :  { %s29_s24 = sshll.u32 %s889_s4, 4  ;;  %s890_s28 = smov 64   ;;  %s30_s24 = int_to_ptr.vmem [resolvable:$true] %s29_s24 }
   0xf   :  { %s891_s29 = smov 4   ;;  %s892_s30 = smov [#allocation8]  }
  0x10   :  { %35 = dma.hbm_to_vmem [thread:$0]  %s28_s23, 256, %s30_s24, [#allocation4], %s890_s28, %s890_s28, %s891_s29  }
  0x11   :  { %s55_s10 = sshll.u32 %s892_s30, 4  ;;  %s81_s12 = sshll.u32 %s1022_s6, 4  ;;  %s56_s10 = int_to_ptr.vmem [resolvable:$true] %s55_s10  ;;  %s82_s12 = int_to_ptr.hbm [resolvable:$true] %s81_s12 }
  0x12   :  { %61 = dma.hbm_to_vmem [thread:$0]  %s54_s27, 1024, %s56_s10, [#allocation7], %s890_s28, %s890_s28, %s891_s29  }
  0x13   :  { %s94_s15 = sshll.u32 %s1023_s7, 4  ;;  %s893_s16 = smov [#allocation11]   ;;  %s95_s15 = int_to_ptr.hbm [resolvable:$true] %s94_s15 }
  0x14   :  { %s83_s17 = sshll.u32 %s893_s16, 4  ;;  %s894_s3 = smov [#allocation12]   ;;  %s84_s17 = int_to_ptr.vmem [resolvable:$true] %s83_s17 }
  0x15   :  { %89 = dma.hbm_to_vmem [thread:$0]  %s82_s12, 512, %s84_s17, [#allocation10], %s886_s19, %s886_s19, %s887_s8  }
  0x16   :  { %s96_s18 = sshll.u32 %s894_s3, 4  ;;  %s97_s18 = int_to_ptr.vmem [resolvable:$true] %s96_s18 }
  0x17   :  { %102 = dma.hbm_to_vmem [thread:$0]  %s95_s15, 512, %s97_s18, [#allocation13], %s886_s19, %s886_s19, %s887_s8  }
  0x18   :  { %875 = dma.done.wait [#allocation4], 256  }
  0x19   :  { %876 = vsyncadd [#allocation4], 4294967040 }
  0x1a   :  { %877 = dma.done.wait [#allocation7], 1536  }
  0x1b   :  { %878 = vsyncadd [#allocation7], 4294965760 }
  0x1c   :  { %879 = dma.done.wait [#allocation10], 2560  }
  0x1d   :  { %880 = vsyncadd [#allocation10], 4294964736 }
  0x1e   :  { %881 = dma.done.wait [#allocation13], 512  }
  0x1f   :  { %882 = vsyncadd [#allocation13], 4294966784  ;;  %v895_v1 = vmov 0   ;;  %vm177_vm0 = vcmask 1041408   ;;  %vm178_vm1 = vcmask 1042432   ;;  %v896_v2 = vmov 65535  }
  0x20   :  { %705 = vset.pattern.permute.xlu1 %v895_v1  ;;  %704 = vset.pattern.permute.xlu0 %v895_v1  ;;  %v179_v3 = vsel %vm177_vm0, 4294967295, %v896_v2  ;;  %v138_v4 = vld [vmem:[#allocation6 + $0x10] sm:$0xff]  ;;  %v136_v5 = vld [vmem:[#allocation6] sm:$0xff]  ;;  %vm170_vm2 = vcmask 39936   ;;  %v139_v11 = vld [vmem:[#allocation6 + $0x18] sm:$0x1] }
  0x21   :  { %706 = vset.pattern.permute.xlu2 %v895_v1  ;;  %v130_v6 = vld [vmem:[%s1016_s0] sm:$0x1f]  ;;  %v180_v7 = vsel %vm178_vm1, %v179_v3, 0  ;;  %152 = vperm.xlu0 %704, %v138_v4   ;;  %v237_v13 = vld [vmem:[#allocation9 + $0x60] sm:$0xff]  ;;  %v623_v15 = vld [vmem:[#allocation3 + $0x8] sm:$0xf] }
  0x22   :  { %142 = vperm.xlu1 %705, %v136_v5   ;;  %v131_v8 = vpack.c.bf16 %v130_v6, %v130_v6  ;;  %v677_v10 = vld [vmem:[#allocation3] sm:$0xff]  ;;  %v137_v12 = vld [vmem:[#allocation6 + $0x8] sm:$0xff]  ;;  %v678_v16 = vld [vmem:[#allocation3 + $0x8] sm:$0x10]  ;;  %vm386_vm3 = vcmask 1043456   ;;  %vm387_vm4 = vcmask 1044480  }
  0x23   :  { %v238_v14 = vld [vmem:[#allocation9 + $0x68] sm:$0xff]  ;;  %v624_v17 = vor.u32 %v678_v16, %v623_v15  ;;  %v236_v18 = vld [vmem:[#allocation9 + $0x58] sm:$0xff]  ;;  %v233_v19 = vld [vmem:[#allocation9 + $0x40] sm:$0xff]  ;;  %v388_v42 = vsel %vm386_vm3, 4294967295, %v896_v2  ;;  %vm361_vm5 = vcmask 203776   ;;  %vm511_vm6 = vcmask 1045504  }
  0x24   :  { %v182_v9 = vand.u32 %v180_v7, %v131_v8  ;;  %v231_v20 = vld [vmem:[#allocation9 + $0x30] sm:$0xff]  ;;  %v232_v21 = vld [vmem:[#allocation9 + $0x38] sm:$0xff]  ;;  %v230_v22 = vld [vmem:[#allocation9 + $0x28] sm:$0xff]  ;;  %v389_v47 = vsel %vm387_vm4, %v388_v42, 0  ;;  %vm512_vm7 = vcmask 1046528   ;;  %vm504_vm8 = vcmask 1022976  }
  0x25   :  { %v227_v23 = vld [vmem:[#allocation9 + $0x10] sm:$0xff]  ;;  %v225_v24 = vld [vmem:[#allocation9] sm:$0xff]  ;;  %v226_v25 = vld [vmem:[#allocation9 + $0x8] sm:$0xff]  ;;  %vm579_vm9 = vcmask 1040384   ;;  %s604_s24 = sshll.u32 %s1025_s9, 4  ;;  %s605_s24 = int_to_ptr.hbm [resolvable:$true] %s604_s24 }
  0x26   :  { %191 = vmatpush.bf16.msra.mxu0 %v182_v9  ;;  %v471_v26 = vld [vmem:[#allocation11 + $0x8] sm:$0xff]  ;;  %v472_v27 = vld [vmem:[#allocation11 + $0x10] sm:$0xff]  ;;  %v549_v28 = vld [vmem:[#allocation12] sm:$0xff] }
  0x27   :  { %v550_v29 = vld [vmem:[#allocation12 + $0x8] sm:$0xff]  ;;  %v552_v30 = vld [vmem:[#allocation12 + $0x18] sm:$0x1]  ;;  %v239_v40 = vld [vmem:[#allocation9 + $0x70] sm:$0xff] }
  0x28   :  { %v588_v31 = vld [vmem:[#allocation2] sm:$0x1]  ;;  %313 = vperm.xlu2 %706, %v239_v40   ;;  %v240_v52 = vld [vmem:[#allocation9 + $0x78] sm:$0x1f]  ;;  %v679_v55 = vld [vmem:[#allocation8] sm:$0xff] }
  0x29   :  { %625 = vmatmul.msk.bf16.vlgmr.msra.gmra.mxu0 %vm170_vm2, %v677_v10  ;;  %157 = vperm.xlu0 %704, %v139_v11   ;;  %v683_v56 = vld [vmem:[#allocation8 + $0x20] sm:$0xff]  ;;  %v235_v57 = vld [vmem:[#allocation9 + $0x50] sm:$0xff]  ;;  %v234_v58 = vld [vmem:[#allocation9 + $0x48] sm:$0xff] }
  0x2a   :  { %147 = vperm.xlu1 %705, %v137_v12   ;;  %v680_v59 = vld [vmem:[#allocation8 + $0x8] sm:$0xff]  ;;  %v229_v61 = vld [vmem:[#allocation9 + $0x20] sm:$0xff]  ;;  %v228_v62 = vld [vmem:[#allocation9 + $0x18] sm:$0xff] }
  0x2b   :  { %v684_v60 = vld [vmem:[#allocation8 + $0x28] sm:$0xff]  ;;  %v681_v63 = vld [vmem:[#allocation8 + $0x10] sm:$0xff]  ;;  %v470_v1 = vld [vmem:[#allocation11] sm:$0xff] }
  0x2c   :  { %v685_v0 = vld [vmem:[#allocation8 + $0x30] sm:$0xff]  ;;  %v473_v3 = vld [vmem:[#allocation11 + $0x18] sm:$0x1]  ;;  %v686_v5 = vld [vmem:[#allocation8 + $0x38] sm:$0x70] }
  0x2d   :  { %v657_v4 = vld [vmem:[#allocation8 + $0x38] sm:$0xf]  ;;  %v551_v8 = vld [vmem:[#allocation12 + $0x10] sm:$0xff] }
  0x2e   :  { %v682_v6 = vld [vmem:[#allocation8 + $0x18] sm:$0xff]  ;;  %v658_v7 = vor.u32 %v686_v5, %v657_v4 }
  0x30   :  { %318 = vperm.xlu2 %706, %v240_v52  }
  0x31   :  { %303 = vperm.xlu0 %704, %v237_v13  }
  0x32   :  { %308 = vperm.xlu1 %705, %v238_v14  }
  0x38   :  { %293 = vperm.xlu2 %706, %v235_v57  }
  0x39   :  { %626 = vmatmul.msk.bf16.gmra.mxu0 %vm170_vm2, %v624_v17  ;;  %298 = vperm.xlu0 %704, %v236_v18  }
  0x3a   :  { %283 = vperm.xlu1 %705, %v233_v19  }
  0x40   :  { %288 = vperm.xlu2 %706, %v234_v58  }
  0x41   :  { %273 = vperm.xlu0 %704, %v231_v20  }
  0x42   :  { %278 = vperm.xlu1 %705, %v232_v21  }
  0x48   :  { %263 = vperm.xlu2 %706, %v229_v61  }
  0x49   :  { %268 = vperm.xlu0 %704, %v230_v22  }
  0x4a   :  { %253 = vperm.xlu1 %705, %v227_v23  }
  0x50   :  { %258 = vperm.xlu2 %706, %v228_v62  }
  0x51   :  { %243 = vperm.xlu0 %704, %v225_v24  }
  0x52   :  { %248 = vperm.xlu1 %705, %v226_v25  }
  0x58   :  { %476 = vperm.xlu2 %706, %v470_v1  }
  0x59   :  { %481 = vperm.xlu0 %704, %v471_v26  }
  0x5a   :  { %486 = vperm.xlu1 %705, %v472_v27  }
  0x60   :  { %491 = vperm.xlu2 %706, %v473_v3  }
  0x61   :  { %555 = vperm.xlu0 %704, %v549_v28  }
  0x62   :  { %560 = vperm.xlu1 %705, %v550_v29  }
  0x68   :  { %565 = vperm.xlu2 %706, %v551_v8  }
  0x69   :  { %570 = vperm.xlu0 %704, %v552_v30  }
  0x6a   :  { %591 = vperm.xlu1 %705, %v588_v31  }
  0x82   :  { %v314_v16 = vpop.permute.xlu2 %313 }
  0x8a   :  { %v319_v19 = vpop.permute.xlu2 %318 }
  0x92   :  { %v294_v24 = vpop.permute.xlu2 %293 }
  0x93   :  { %v153_v34 = vpop.permute.xlu0 %152 }
  0x94   :  { %v143_v35 = vpop.permute.xlu1 %142 }
  0x9a   :  { %v289_v30 = vpop.permute.xlu2 %288 }
  0x9b   :  { %v158_v38 = vpop.permute.xlu0 %157 }
  0x9c   :  { %v148_v43 = vpop.permute.xlu1 %147 }
  0xa3   :  { %v304_v23 = vpop.permute.xlu0 %303 }
  0xa4   :  { %v309_v22 = vpop.permute.xlu1 %308 }
  0xa6   :  { %v193_v32 = vpop.f32.mrf.mxu0 }
  0xa7   :  { %v194_v48 = vadd.f32 %v193_v32, %v143_v35 }
  0xa9   :  { %v203_v53 = vmax.f32 %v194_v48, 0.0  ;;  %v264_v48 = vpop.permute.xlu2 %263 }
  0xab   :  { %v299_v28 = vpop.permute.xlu0 %298 }
  0xac   :  { %v284_v27 = vpop.permute.xlu1 %283 }
  0xae   :  { %v195_v33 = vpop.f32.mrf.mxu0 }
  0xaf   :  { %v196_v44 = vadd.f32 %v195_v33, %v148_v43  ;;  %v513_v33 = vsel %vm511_vm6, 4294967295, %v896_v2 }
  0xb1   :  { %v204_v50 = vmax.f32 %v196_v44, 0.0  ;;  %v259_v1 = vpop.permute.xlu2 %258 }
  0xb3   :  { %v207_v54 = vpack.c.bf16 %v204_v50, %v203_v53 }
  0xb6   :  { %v198_v36 = vpop.f32.mrf.mxu0 }
  0xb7   :  { %v199_v37 = vadd.f32 %v198_v36, %v153_v34 }
  0xb9   :  { %v205_v45 = vmax.f32 %v199_v37, 0.0 }
  0xbe   :  { %v200_v39 = vpop.f32.mrf.mxu0 }
  0xbf   :  { %v201_v41 = vadd.f32 %v200_v39, %v158_v38  ;;  %v514_v38 = vsel %vm512_vm7, %v513_v33, 0 }
  0xc1   :  { %v206_v46 = vmax.f32 %v201_v41, 0.0  ;;  %v279_v41 = vpop.permute.xlu1 %278 }
  0xc3   :  { %v208_v49 = vpack.c.bf16 %v206_v46, %v205_v45  ;;  %v274_v45 = vpop.permute.xlu0 %273 }
  0xc5   :  { %v391_v51 = vand.u32 %v389_v47, %v208_v49 }
  0xc7   :  { %399 = vmatpush.bf16.msra.mxu1 %v391_v51  ;;  %689 = vmatpush.bf16.msra.mxu3 %v391_v51 }
  0xc9   :  { %v254_v57 = vpop.permute.xlu1 %253 }
  0xcb   :  { %400 = vmatpush.bf16.msra.mxu1 %v207_v54  ;;  %690 = vmatpush.bf16.msra.mxu3 %v207_v54 }
  0xce   :  { %659 = vmatmul.msk.bf16.vlgmr.msra.gmra.mxu1 %vm361_vm5, %v679_v55  ;;  %663 = vmatmul.msk.bf16.vlgmr.msra.gmra.mxu3 %vm361_vm5, %v683_v56 }
  0xde   :  { %660 = vmatmul.msk.bf16.gmra.mxu1 %vm361_vm5, %v680_v59  ;;  %664 = vmatmul.msk.bf16.gmra.mxu3 %vm361_vm5, %v684_v60  ;;  %v269_v60 = vpop.permute.xlu0 %268 }
  0xee   :  { %661 = vmatmul.msk.bf16.gmra.mxu1 %vm361_vm5, %v681_v63  ;;  %665 = vmatmul.msk.bf16.gmra.mxu3 %vm361_vm5, %v685_v0 }
  0xfe   :  { %662 = vmatmul.msk.bf16.gmra.mxu1 %vm361_vm5, %v682_v6  ;;  %666 = vmatmul.msk.bf16.gmra.mxu3 %vm361_vm5, %v658_v7 }
 0x14b   :  { %v994_v9 = vpop.f32.mrf.mxu1 }
 0x151   :  { %v422_v10 = vpop.f32.mrf.mxu3 }
 0x152   :  { %v423_v52 = vadd.f32 %v422_v10, %v284_v27  ;;  %v249_v10 = vpop.permute.xlu1 %248 }
 0x153   :  { %v996_v11 = vpop.f32.mrf.mxu1 }
 0x154   :  { %v450_v58 = vmax.f32 %v423_v52, 0.0 }
 0x159   :  { %v424_v12 = vpop.f32.mrf.mxu3 }
 0x15a   :  { %v425_v49 = vadd.f32 %v424_v12, %v289_v30  ;;  %v405_v12 = vadd.f32 %v996_v11, %v249_v10  ;;  %v673_v11 = vld [vmem:[%s1021_s5 + $0x8] sm:$0xf]  ;;  %v487_v30 = vpop.permute.xlu1 %486 }
 0x15b   :  { %v998_v14 = vpop.f32.mrf.mxu1 }
 0x15c   :  { %v451_v54 = vmax.f32 %v425_v49, 0.0  ;;  %v408_v8 = vadd.f32 %v998_v14, %v254_v57  ;;  %v687_v14 = vld [vmem:[%s1021_s5] sm:$0xff] }
 0x15e   :  { %v462_v0 = vpack.c.bf16 %v451_v54, %v450_v58 }
 0x161   :  { %v427_v13 = vpop.f32.mrf.mxu3 }
 0x162   :  { %v428_v46 = vadd.f32 %v427_v13, %v294_v24 }
 0x163   :  { %v409_v17 = vpop.f32.mrf.mxu1 }
 0x164   :  { %v452_v53 = vmax.f32 %v428_v46, 0.0  ;;  %v410_v4 = vadd.f32 %v409_v17, %v259_v1  ;;  %v561_v46 = vpop.permute.xlu1 %560 }
 0x166   :  { %v445_v13 = vmax.f32 %v410_v4, 0.0 }
 0x169   :  { %v429_v15 = vpop.f32.mrf.mxu3 }
 0x16a   :  { %v430_v42 = vadd.f32 %v429_v15, %v299_v28 }
 0x16b   :  { %v412_v20 = vpop.f32.mrf.mxu1 }
 0x16c   :  { %v453_v50 = vmax.f32 %v430_v42, 0.0  ;;  %v413_v61 = vadd.f32 %v412_v20, %v264_v48  ;;  %v443_v20 = vmax.f32 %v405_v12, 0.0 }
 0x16e   :  { %v463_v56 = vpack.c.bf16 %v453_v50, %v452_v53  ;;  %v446_v5 = vmax.f32 %v413_v61, 0.0 }
 0x171   :  { %v432_v18 = vpop.f32.mrf.mxu3 }
 0x172   :  { %v433_v39 = vadd.f32 %v432_v18, %v304_v23 }
 0x173   :  { %v414_v25 = vpop.f32.mrf.mxu1 }
 0x174   :  { %v454_v47 = vmax.f32 %v433_v39, 0.0  ;;  %v415_v62 = vadd.f32 %v414_v25, %v269_v60 }
 0x176   :  { %v447_v6 = vmax.f32 %v415_v62, 0.0 }
 0x178   :  { %v460_v15 = vpack.c.bf16 %v447_v6, %v446_v5 }
 0x179   :  { %v434_v21 = vpop.f32.mrf.mxu3 }
 0x17a   :  { %v435_v35 = vadd.f32 %v434_v21, %v309_v22 }
 0x17b   :  { %v417_v34 = vpop.f32.mrf.mxu1 }
 0x17c   :  { %v455_v43 = vmax.f32 %v435_v35, 0.0  ;;  %v418_v59 = vadd.f32 %v417_v34, %v274_v45 }
 0x17e   :  { %v464_v51 = vpack.c.bf16 %v455_v43, %v454_v47  ;;  %v448_v3 = vmax.f32 %v418_v59, 0.0 }
 0x181   :  { %v437_v26 = vpop.f32.mrf.mxu3 }
 0x182   :  { %v438_v29 = vadd.f32 %v437_v26, %v314_v16  ;;  %v244_v16 = vpop.permute.xlu0 %243  ;;  %v477_v26 = vpop.permute.xlu2 %476 }
 0x183   :  { %v419_v2 = vpop.f32.mrf.mxu1  ;;  %v403_v18 = vadd.f32 %v994_v9, %v244_v16  ;;  %v688_v9 = vld [vmem:[%s1021_s5 + $0x8] sm:$0x10]  ;;  %s897_s5 = smov [#allocation14]  }
 0x184   :  { %v456_v36 = vmax.f32 %v438_v29, 0.0  ;;  %v420_v55 = vadd.f32 %v419_v2, %v279_v41  ;;  %v674_v23 = vor.u32 %v688_v9, %v673_v11  ;;  %s602_s2 = sshll.u32 %s897_s5, 4  ;;  %s603_s2 = int_to_ptr.vmem [resolvable:$true] %s602_s2 }
 0x185   :  { %v442_v22 = vmax.f32 %v403_v18, 0.0 }
 0x186   :  { %v449_v63 = vmax.f32 %v420_v55, 0.0 }
 0x187   :  { %v458_v17 = vpack.c.bf16 %v443_v20, %v442_v22 }
 0x188   :  { %v461_v7 = vpack.c.bf16 %v449_v63, %v448_v3  ;;  %v592_v63 = vpop.permute.xlu1 %591 }
 0x189   :  { %v439_v31 = vpop.f32.mrf.mxu3  ;;  %v594_v1 = vperm.slane %v592_v63, 0 }
 0x18a   :  { %v440_v32 = vadd.f32 %v439_v31, %v319_v19  ;;  %v444_v19 = vmax.f32 %v408_v8, 0.0  ;;  %v482_v27 = vpop.permute.xlu0 %481  ;;  %v492_v35 = vpop.permute.xlu2 %491 }
 0x18c   :  { %v457_v37 = vmax.f32 %v440_v32, 0.0  ;;  %v459_v21 = vpack.c.bf16 %v445_v13, %v444_v19 }
 0x18e   :  { %v465_v40 = vpack.c.bf16 %v457_v37, %v456_v36 }
 0x190   :  { %v516_v44 = vand.u32 %v514_v38, %v465_v40 }
 0x192   :  { %518 = vmatpush.bf16.msra.mxu2 %v516_v44  ;;  %v556_v38 = vpop.permute.xlu0 %555  ;;  %v566_v49 = vpop.permute.xlu2 %565 }
 0x196   :  { %519 = vmatpush.bf16.msra.mxu2 %v464_v51 }
 0x19a   :  { %520 = vmatpush.bf16.msra.mxu2 %v463_v56  ;;  %v571_v53 = vpop.permute.xlu0 %570 }
 0x19e   :  { %521 = vmatpush.bf16.msra.mxu2 %v462_v0 }
 0x1a2   :  { %522 = vmatpush.bf16.msra.mxu2 %v461_v7 }
 0x1a6   :  { %523 = vmatpush.bf16.msra.mxu2 %v460_v15 }
 0x1aa   :  { %524 = vmatpush.bf16.msra.mxu2 %v459_v21 }
 0x1ae   :  { %525 = vmatpush.bf16.msra.mxu2 %v458_v17 }
 0x1b1   :  { %675 = vmatmul.msk.bf16.vlgmr.msra.gmra.mxu2 %vm504_vm8, %v687_v14 }
 0x1c1   :  { %676 = vmatmul.msk.bf16.gmra.mxu2 %vm504_vm8, %v674_v23 }
 0x234   :  { %v527_v24 = vpop.f32.mrf.mxu2 }
 0x235   :  { %v528_v29 = vadd.f32 %v527_v24, %v477_v26 }
 0x237   :  { %v537_v34 = vmax.f32 %v528_v29, 0.0 }
 0x239   :  { %v541_v39 = vpack.c.bf16 %v537_v34, %v537_v34 }
 0x23b   :  { %v545_v44 = vunpack.c.l.bf16 %v541_v39 }
 0x23c   :  { %v529_v25 = vpop.f32.mrf.mxu2 }
 0x23d   :  { %v530_v28 = vadd.f32 %v529_v25, %v482_v27  ;;  %v573_v51 = vmul.f32 %v556_v38, %v545_v44 }
 0x23f   :  { %v538_v31 = vmax.f32 %v530_v28, 0.0 }
 0x241   :  { %v542_v37 = vpack.c.bf16 %v538_v31, %v538_v31 }
 0x243   :  { %v546_v41 = vunpack.c.l.bf16 %v542_v37 }
 0x244   :  { %v532_v32 = vpop.f32.mrf.mxu2 }
 0x245   :  { %v533_v33 = vadd.f32 %v532_v32, %v487_v30  ;;  %v574_v48 = vmul.f32 %v561_v46, %v546_v41 }
 0x247   :  { %v539_v36 = vmax.f32 %v533_v33, 0.0  ;;  %v577_v54 = vadd.f32 %v574_v48, %v573_v51 }
 0x249   :  { %v543_v40 = vpack.c.bf16 %v539_v36, %v539_v36 }
 0x24b   :  { %v547_v45 = vunpack.c.l.bf16 %v543_v40 }
 0x24c   :  { %v534_v42 = vpop.f32.mrf.mxu2 }
 0x24d   :  { %v535_v43 = vadd.f32 %v534_v42, %v492_v35  ;;  %v575_v2 = vmul.f32 %v566_v49, %v547_v45 }
 0x24f   :  { %v540_v47 = vmax.f32 %v535_v43, 0.0  ;;  %v578_v56 = vadd.f32 %v577_v54, %v575_v2 }
 0x251   :  { %v544_v50 = vpack.c.bf16 %v540_v47, %v540_v47 }
 0x253   :  { %v548_v52 = vunpack.c.l.bf16 %v544_v50 }
 0x255   :  { %v576_v55 = vmul.f32 %v571_v53, %v548_v52 }
 0x257   :  { %v580_v57 = vsel %vm579_vm9, %v576_v55, 0.0 }
 0x258   :  { %v581_v58 = vadd.f32 %v580_v57, %v578_v56 }
 0x25a   :  { %v582_v59 = vrot.slane %v581_v58, 4 }
 0x25c   :  { %v583_v60 = vadd.f32 %v582_v59, %v581_v58 }
 0x25e   :  { %v584_v61 = vrot.slane %v583_v60, 2 }
 0x260   :  { %v585_v62 = vadd.f32 %v584_v61, %v583_v60 }
 0x262   :  { %v586_v0 = vrot.slane %v585_v62, 1 }
 0x264   :  { %v587_v3 = vadd.f32 %v586_v0, %v585_v62 }
 0x266   :  { %v595_v4 = vadd.f32 %v594_v1, %v587_v3 }
 0x268   :  { %596 = vst [vmem:[#allocation14] sm:$0x1] %v595_v4 }
 0x269   :  { %607 = dma.vmem_to_hbm [thread:$0]  %s603_s2, 16, %s605_s24, [#allocation5]  }
 0x26a   :  { %883 = dma.done.wait [#allocation5], 16  }
 0x26b   :  { %884 = vsyncadd [#allocation5], 4294967280 }
 0x26c   :  { %612 = vsyncpa [#allocation4], 1 }
 0x26d   :  { %613 = vsyncpa [#allocation7], 1 }
 0x26e   :  { %614 = vsyncpa [#allocation10], 1 }
 0x26f   :  { %615 = vsyncpa [#allocation13], 1 }
 0x270   :  { %616 = vsyncpa [#allocation5], 1 }

</bundles_post_ra>
